<compile_context>
chip_gen: v7x
topology: tpu7x:2x2x1
jax: 0.10.0
libtpu: 0.0.40
codegen_flags: <defaults>
</compile_context>

<pallas_src>
import math

import jax
import jax.numpy as jnp
from jax.experimental import pallas as pl
from jax.experimental.pallas import tpu as pltpu

_GELU_C = math.sqrt(2.0 / math.pi)


def _round_up(x: int, m: int) -> int:
    return ((x + m - 1) // m) * m


def _vmem_cap_bytes() -> int:
    """Physical VMEM for this generation, with ~15% headroom."""
    try:
        cap = int(pltpu.get_tpu_info().vmem_capacity_bytes)
    except Exception:
        cap = 64 << 20  # conservative fallback: v7x per-TC VMEM
    return max(int(cap * 0.85), 32 << 20)


def _choose_th(H: int, C: int, tm: int, w_bytes: int, x_bytes: int,
               o_bytes: int, budget: int):
    """Largest hidden-slice th (multiple of 128 dividing H, or H itself) whose
    resident footprint fits the VMEM budget. Returns (th, footprint_bytes)."""

    def footprint(th: int, w_bufs: int) -> int:
        w = (C * th + th + th * C) * w_bytes * w_bufs + C * w_bytes  # b_proj 1-buf
        io = 2 * tm * C * (x_bytes + o_bytes)          # double-buffered x/out tiles
        acc = tm * C * 4                               # f32 accumulator scratch
        interm = tm * th * (4 + 4 + w_bytes)           # f32 h pre/post GELU + cast
        return w + io + acc + interm

    if footprint(H, 1) <= budget:
        return H, footprint(H, 1)                      # fully resident weights
    for th in (8192, 4096, 2048, 1024, 512, 256, 128):
        if th < H and H % th == 0 and footprint(th, 2) <= budget:
            return th, footprint(th, 2)                # streamed weight slices
    for th in (128, 256, 512):                         # smallest legal slice
        if th < H and H % th == 0:
            return th, footprint(th, 2)
    return H, footprint(H, 1)                          # H not 128-tileable: resident


def _gpt2_mlp_kernel(x_ref, wfc_ref, bfc_ref, wproj_ref, bproj_ref, o_ref, acc_ref):
    # x_ref:     (tm, C)   token tile (model dtype)
    # wfc_ref:   (C, th)   c_fc weight slice
    # bfc_ref:   (1, th)   c_fc bias slice
    # wproj_ref: (th, C)   c_proj weight slice
    # bproj_ref: (1, C)    c_proj bias (resident)
    # o_ref:     (tm, C)   output tile
    # acc_ref:   (tm, C)   f32 accumulator (persists across the hidden axis)
    h_idx = pl.program_id(1)

    @pl.when(h_idx == 0)
    def _():
        acc_ref[...] = jnp.zeros_like(acc_ref)

    # c_fc slice: (tm, C) @ (C, th) -> f32 accumulation on the MXU.
    h = jnp.dot(x_ref[...], wfc_ref[...], preferred_element_type=jnp.float32)
    h = h + bfc_ref[...].astype(jnp.float32)

    # tanh-approx GELU in f32 (EUP tanh is free filler next to the MXU dots).
    h = 0.5 * h * (1.0 + jnp.tanh(_GELU_C * (h + 0.044715 * (h * h * h))))

    # c_proj partial: feed the weight dtype into the MXU, accumulate in f32.
    acc_ref[...] += jnp.dot(h.astype(wproj_ref.dtype), wproj_ref[...],
                            preferred_element_type=jnp.float32)

    @pl.when(h_idx == pl.num_programs(1) - 1)
    def _():
        y = acc_ref[...] + bproj_ref[...].astype(jnp.float32)
        # dropout: identity (eval / inference mode)
        o_ref[...] = y.astype(o_ref.dtype)


def gpt2_mlp(x, w_fc, b_fc, w_proj, b_proj, *, tile_m=512):
    """x: (B, T, C). Weights: w_fc (C, 4C), b_fc (4C,), w_proj (4C, C), b_proj (C,).

    Runs in the caller's dtype (pass bf16 params/activations for the MXU fast
    path; accumulation is always f32).  Production GPT-2 C/H are 128-multiples
    so stores stay lane-dense; the toy demo (C=32) only exercises correctness.
    """
    B, T, C = x.shape
    H = w_fc.shape[1]
    M = B * T

    x_bytes = jnp.dtype(x.dtype).itemsize
    w_bytes = jnp.dtype(w_fc.dtype).itemsize

    # Token tile: large enough to amortize per-grid-step overhead, small enough
    # that grid_m >= 2 so the "parallel" M axis feeds both v7x TensorCores.
    tm = max(8, min(_round_up(tile_m, 8), _round_up(pl.cdiv(M, 2), 8)))
    grid_m = pl.cdiv(M, tm)  # ragged last block handled by Pallas (clipped DMAs)

    vmem_cap = _vmem_cap_bytes()
    th, footprint = _choose_th(H, C, tm, w_bytes, x_bytes, x_bytes,
                               int(vmem_cap * 0.9))
    grid_h = pl.cdiv(H, th)
    resident = grid_h == 1

    # Constant-index (fully resident) operands need only one buffer; streamed
    # hidden-axis slices keep default double-buffering for DMA/compute overlap.
    w_mode = pl.Buffered(1) if resident else None

    x2d = x.reshape(M, C)
    b_fc2 = b_fc.reshape(1, H)
    b_proj2 = b_proj.reshape(1, C)

    # Scoped VMEM: measured footprint with 2x headroom, floored at the default
    # scoped limit, capped below this generation's physical VMEM.
    vmem_limit = int(min(max(2 * footprint + (4 << 20), 32 << 20), vmem_cap))

    cost = pl.CostEstimate(
        flops=4 * M * C * H,                    # two matmuls, 2*M*C*H each
        transcendentals=M * H,                  # one tanh per hidden activation
        bytes_accessed=int(2 * M * C * x_bytes
                           + (C * H + H * C + H + C) * w_bytes),
    )

    out2d = pl.pallas_call(
        _gpt2_mlp_kernel,
        out_shape=jax.ShapeDtypeStruct((M, C), x.dtype),
        grid_spec=pltpu.PrefetchScalarGridSpec(
            num_scalar_prefetch=0,
            grid=(grid_m, grid_h),
            in_specs=[
                pl.BlockSpec((tm, C), lambda i, h: (i, 0)),   # x tile
                pl.BlockSpec((C, th), lambda i, h: (0, h),    # c_fc weight slice
                             pipeline_mode=w_mode),
                pl.BlockSpec((1, th), lambda i, h: (0, h),    # c_fc bias slice
                             pipeline_mode=w_mode),
                pl.BlockSpec((th, C), lambda i, h: (h, 0),    # c_proj weight slice
                             pipeline_mode=w_mode),
                pl.BlockSpec((1, C), lambda i, h: (0, 0),     # c_proj bias (resident)
                             pipeline_mode=pl.Buffered(1)),
            ],
            out_specs=pl.BlockSpec((tm, C), lambda i, h: (i, 0)),
            scratch_shapes=[pltpu.VMEM((tm, C), jnp.float32)],
        ),
        compiler_params=pltpu.CompilerParams(
            dimension_semantics=("parallel", "arbitrary"),
            vmem_limit_bytes=vmem_limit,
        ),
        cost_estimate=cost,
    )(x2d, w_fc, b_fc2, w_proj, b_proj2)

    return out2d.reshape(B, T, C)


def _reference_mlp(x, w_fc, b_fc, w_proj, b_proj):
    h = jnp.einsum("btc,ch->bth", x, w_fc) + b_fc
    h = 0.5 * h * (1.0 + jnp.tanh(_GELU_C * (h + 0.044715 * h**3)))
    return jnp.einsum("bth,hc->btc", h, w_proj) + b_proj


if __name__ == "__main__":
    key = jax.random.PRNGKey(0)
    B, T, n_embd = 2, 8, 32
    hidden = 4 * n_embd  # 128

    k_x, k_wfc, k_bfc, k_wp, k_bp = jax.random.split(key, 5)

    x = jax.random.normal(k_x, (B, T, n_embd), dtype=jnp.float32)

    # Deterministic init mimicking nn.Linear (uniform +/- 1/sqrt(fan_in)).
    bound_fc = 1.0 / math.sqrt(n_embd)
    w_fc = jax.random.uniform(k_wfc, (n_embd, hidden), jnp.float32,
                              -bound_fc, bound_fc)
    b_fc = jax.random.uniform(k_bfc, (hidden,), jnp.float32,
                              -bound_fc, bound_fc)

    bound_pj = 1.0 / math.sqrt(hidden)
    w_proj = jax.random.uniform(k_wp, (hidden, n_embd), jnp.float32,
                                -bound_pj, bound_pj)
    b_proj = jax.random.uniform(k_bp, (n_embd,), jnp.float32,
                                -bound_pj, bound_pj)

    ref = _reference_mlp(x, w_fc, b_fc, w_proj, b_proj)

    # f32 path (matches the f32 reference tightly).
    out = gpt2_mlp(x, w_fc, b_fc, w_proj, b_proj)
    out = jax.block_until_ready(out)
    assert out.shape == (B, T, n_embd)
    assert jnp.allclose(out, ref, atol=1e-5, rtol=1e-5), "f32 mismatch vs reference"

    # bf16 fast path (bf16 MXU inputs, f32 accumulation) — loose tolerance.
    out_bf16 = gpt2_mlp(
        x.astype(jnp.bfloat16),
        w_fc.astype(jnp.bfloat16), b_fc.astype(jnp.bfloat16),
        w_proj.astype(jnp.bfloat16), b_proj.astype(jnp.bfloat16),
    )
    out_bf16 = jax.block_until_ready(out_bf16)
    assert out_bf16.shape == (B, T, n_embd)
    assert jnp.allclose(out_bf16.astype(jnp.float32), ref, atol=5e-2, rtol=5e-2), \
        "bf16 mismatch vs reference"

    print("KERNEL_OK")
</pallas_src>

<mosaic_0001>
module attributes {stable_mosaic.version = 11 : i64} {
  func.func @_gpt2_mlp_kernel(%arg0: i32, %arg1: i32, %arg2: memref<8x32xf32, #tpu.memory_space<vmem>>, %arg3: memref<32x128xf32, #tpu.memory_space<vmem>>, %arg4: memref<1x128xf32, #tpu.memory_space<vmem>>, %arg5: memref<128x32xf32, #tpu.memory_space<vmem>>, %arg6: memref<1x32xf32, #tpu.memory_space<vmem>>, %arg7: memref<8x32xf32, #tpu.memory_space<vmem>>, %arg8: memref<8x32xf32, #tpu.memory_space<vmem>>) attributes {dimension_semantics = [#tpu.dimension_semantics<parallel>, #tpu.dimension_semantics<arbitrary>], iteration_bounds = array<i64: 2, 1>, scalar_prefetch = 0 : i64, scratch_operands = 1 : i64, tpu.core_type = #tpu.core_type<tc>, window_params = [{transform_indices = @transform_0, window_bounds = array<i64: 8, 32>}, {pipeline_mode = #tpu.pipeline_mode<synchronous>, transform_indices = @transform_1, window_bounds = array<i64: 32, 128>}, {pipeline_mode = #tpu.pipeline_mode<synchronous>, transform_indices = @transform_2, window_bounds = array<i64: 1, 128>}, {pipeline_mode = #tpu.pipeline_mode<synchronous>, transform_indices = @transform_3, window_bounds = array<i64: 128, 32>}, {pipeline_mode = #tpu.pipeline_mode<synchronous>, transform_indices = @transform_4, window_bounds = array<i64: 1, 32>}, {transform_indices = @transform_5, window_bounds = array<i64: 8, 32>}]} {
    %c0_i32 = arith.constant 0 : i32
    %0 = arith.cmpi eq, %arg1, %c0_i32 : i32
    %1 = arith.extui %0 : i1 to i32
    %c0_i32_0 = arith.constant 0 : i32
    %2 = arith.cmpi ne, %1, %c0_i32_0 : i32
    scf.if %2 {
      %cst_19 = arith.constant 0.000000e+00 : f32
      %30 = vector.broadcast %cst_19 : f32 to vector<8x32xf32>
      %c0_20 = arith.constant 0 : index
      %c0_21 = arith.constant 0 : index
      %31 = vector.load %arg8[%c0_20, %c0_21] : memref<8x32xf32, #tpu.memory_space<vmem>>, vector<8x32xf32>
      tpu.vector_store %arg8[%c0_20, %c0_21], %30 {strides = array<i32>} : memref<8x32xf32, #tpu.memory_space<vmem>>, vector<8x32xf32>,
    } else {
    }
    %c0 = arith.constant 0 : index
    %c0_1 = arith.constant 0 : index
    %3 = vector.load %arg2[%c0, %c0_1] : memref<8x32xf32, #tpu.memory_space<vmem>>, vector<8x32xf32>
    %c0_2 = arith.constant 0 : index
    %c0_3 = arith.constant 0 : index
    %4 = vector.load %arg3[%c0_2, %c0_3] : memref<32x128xf32, #tpu.memory_space<vmem>>, vector<32x128xf32>
    %cst = arith.constant dense<0.000000e+00> : vector<8x128xf32>
    %5 = tpu.matmul %3, %4, %cst {dimension_numbers = #tpu.dot_dimension_numbers<[1], [0], [0], [1], [0, 0, 1, 1], [], []>} : vector<8x32xf32>, vector<32x128xf32>, vector<8x128xf32> -> vector<8x128xf32>
    %c0_4 = arith.constant 0 : index
    %c0_5 = arith.constant 0 : index
    %6 = vector.load %arg4[%c0_4, %c0_5] : memref<1x128xf32, #tpu.memory_space<vmem>>, vector<1x128xf32>
    %7 = vector.broadcast %6 : vector<1x128xf32> to vector<8x128xf32>
    %8 = arith.addf %5, %7 : vector<8x128xf32>
    %cst_6 = arith.constant 5.000000e-01 : f32
    %9 = vector.broadcast %cst_6 : f32 to vector<8x128xf32>
    %10 = arith.mulf %9, %8 : vector<8x128xf32>
    %11 = arith.mulf %8, %8 : vector<8x128xf32>
    %12 = arith.mulf %11, %8 : vector<8x128xf32>
    %cst_7 = arith.constant 4.471500e-02 : f32
    %13 = vector.broadcast %cst_7 : f32 to vector<8x128xf32>
    %14 = arith.mulf %13, %12 : vector<8x128xf32>
    %15 = arith.addf %8, %14 : vector<8x128xf32>
    %cst_8 = arith.constant 0.797884583 : f32
    %16 = vector.broadcast %cst_8 : f32 to vector<8x128xf32>
    %17 = arith.mulf %16, %15 : vector<8x128xf32>
    %18 = math.tanh %17 : vector<8x128xf32>
    %cst_9 = arith.constant 1.000000e+00 : f32
    %19 = vector.broadcast %cst_9 : f32 to vector<8x128xf32>
    %20 = arith.addf %19, %18 : vector<8x128xf32>
    %21 = arith.mulf %10, %20 : vector<8x128xf32>
    %c0_10 = arith.constant 0 : index
    %c0_11 = arith.constant 0 : index
    %22 = vector.load %arg8[%c0_10, %c0_11] : memref<8x32xf32, #tpu.memory_space<vmem>>, vector<8x32xf32>
    %c0_12 = arith.constant 0 : index
    %c0_13 = arith.constant 0 : index
    %23 = vector.load %arg5[%c0_12, %c0_13] : memref<128x32xf32, #tpu.memory_space<vmem>>, vector<128x32xf32>
    %cst_14 = arith.constant dense<0.000000e+00> : vector<8x32xf32>
    %24 = tpu.matmul %21, %23, %cst_14 {dimension_numbers = #tpu.dot_dimension_numbers<[1], [0], [0], [1], [0, 0, 1, 1], [], []>} : vector<8x128xf32>, vector<128x32xf32>, vector<8x32xf32> -> vector<8x32xf32>
    %25 = arith.addf %22, %24 : vector<8x32xf32>
    %c0_15 = arith.constant 0 : index
    %c0_16 = arith.constant 0 : index
    %26 = vector.load %arg8[%c0_15, %c0_16] : memref<8x32xf32, #tpu.memory_space<vmem>>, vector<8x32xf32>
    tpu.vector_store %arg8[%c0_15, %c0_16], %25 {strides = array<i32>} : memref<8x32xf32, #tpu.memory_space<vmem>>, vector<8x32xf32>,
    %c0_i32_17 = arith.constant 0 : i32
    %27 = arith.cmpi eq, %arg1, %c0_i32_17 : i32
    %28 = arith.extui %27 : i1 to i32
    %c0_i32_18 = arith.constant 0 : i32
    %29 = arith.cmpi ne, %28, %c0_i32_18 : i32
    scf.if %29 {
      %c0_19 = arith.constant 0 : index
      %c0_20 = arith.constant 0 : index
      %30 = vector.load %arg8[%c0_19, %c0_20] : memref<8x32xf32, #tpu.memory_space<vmem>>, vector<8x32xf32>
      %c0_21 = arith.constant 0 : index
      %c0_22 = arith.constant 0 : index
      %31 = vector.load %arg6[%c0_21, %c0_22] : memref<1x32xf32, #tpu.memory_space<vmem>>, vector<1x32xf32>
      %32 = vector.broadcast %31 : vector<1x32xf32> to vector<8x32xf32>
      %33 = arith.addf %30, %32 : vector<8x32xf32>
      %c0_23 = arith.constant 0 : index
      %c0_24 = arith.constant 0 : index
      %34 = vector.load %arg7[%c0_23, %c0_24] : memref<8x32xf32, #tpu.memory_space<vmem>>, vector<8x32xf32>
      tpu.vector_store %arg7[%c0_23, %c0_24], %33 {strides = array<i32>} : memref<8x32xf32, #tpu.memory_space<vmem>>, vector<8x32xf32>,
    } else {
    }
    return
  }
  func.func @transform_0(%arg0: i32, %arg1: i32) -> (i32, i32) {
    %c0_i32 = arith.constant 0 : i32
    %c0_i32_0 = arith.constant 0 : i32
    return %arg0, %c0_i32 : i32, i32
  }
  func.func @transform_1(%arg0: i32, %arg1: i32) -> (i32, i32) {
    %c0_i32 = arith.constant 0 : i32
    %c0_i32_0 = arith.constant 0 : i32
    return %c0_i32, %arg1 : i32, i32
  }
  func.func @transform_2(%arg0: i32, %arg1: i32) -> (i32, i32) {
    %c0_i32 = arith.constant 0 : i32
    %c0_i32_0 = arith.constant 0 : i32
    return %c0_i32, %arg1 : i32, i32
  }
  func.func @transform_3(%arg0: i32, %arg1: i32) -> (i32, i32) {
    %c0_i32 = arith.constant 0 : i32
    %c0_i32_0 = arith.constant 0 : i32
    return %arg1, %c0_i32 : i32, i32
  }
  func.func @transform_4(%arg0: i32, %arg1: i32) -> (i32, i32) {
    %c0_i32 = arith.constant 0 : i32
    %c0_i32_0 = arith.constant 0 : i32
    %c0_i32_1 = arith.constant 0 : i32
    return %c0_i32, %c0_i32_0 : i32, i32
  }
  func.func @transform_5(%arg0: i32, %arg1: i32) -> (i32, i32) {
    %c0_i32 = arith.constant 0 : i32
    %c0_i32_0 = arith.constant 0 : i32
    return %arg0, %c0_i32 : i32, i32
  }
}

</mosaic_0001>

<bundles_post_ra>
// kernel: tpu_custom_call.1
= control target key start
LH: loop header
LB: loop body
LE: loop exit
PB: predicated region body
PF: predicated region fallthrough
CT: control target
= control target key end

     0   :  { %10 = vsyncpa [#allocation4], 0  ;;  %s1082_s0 = inlined_call_operand.vmem [shape: f32[16,32], index: 0, kind: input, shape index: {}]   ;;  %s1083_s1 = inlined_call_operand.vmem [shape: f32[32,128], index: 1, kind: input, shape index: {}]   ;;  %s1084_s2 = inlined_call_operand.vmem [shape: f32[1,128], index: 2, kind: input, shape index: {}]   ;;  %s1085_s3 = inlined_call_operand.vmem [shape: f32[128,32], index: 3, kind: input, shape index: {}]   ;;  %s1086_s4 = inlined_call_operand.vmem [shape: f32[1,32], index: 4, kind: input, shape index: {}]   ;;  %s1087_s5 = inlined_call_operand.hbm [shape: f32[16,32], index: 5, kind: output, shape index: {}]  }
   0x1   :  { %12 = vsyncpa [#allocation4 + $0x1], 0  ;;  %s900_s18 = smov 0   ;;  %s902_s19 = smov 0  }
   0x2   :  { %s904_s20 = smov 0   ;;  %s906_s21 = smov 0  }
   0x3   :  { %s908_s22 = smov 0   ;;  %s910_s23 = smov 0  }
   0x4 LB: > { %s611_s24 = sadd.s32 4294967295, %s864_s23   ;;  %s612_s25 = sadd.s32 4294967294, %s864_s23   ;;  %s864_s23 = sphi %s910_s23, %s18_s23   ;;  %s860_s22 = sphi %s908_s22, %s1094_s22   ;;  %s856_s21 = sphi %s906_s21, %s1093_s21   ;;  %s852_s20 = sphi %s904_s20, %s1092_s20   ;;  %s848_s19 = sphi %s902_s19, %s1091_s19   ;;  %s844_s18 = sphi %s900_s18, %s1090_s18  }
   0x5   : > { %s30_s26 = sadd.s32 1, %s860_s22  ;;  %s162_s27 = sadd.s32 1, %s852_s20 }
   0x6   : > { %p32_p0 = scmp.ge.s32.totalorder %s30_s26, 2  ;;  %p172_p1 = scmp.ne.s32.totalorder %s852_s20, %s848_s19 }
   0x7   : > { %p173_p2 = scmp.eq.s32.totalorder %s611_s24, 1  ;;  %p178_p3 = scmp.ne.s32.totalorder %s848_s19, %s844_s18 }
   0x8   : > { %s1096_s26 = smov (%p32_p0, %s30_s26), 0  ;;  %p179_p5 = scmp.eq.s32.totalorder %s612_s25, 1 }
   0x9   : > { %p940_p4 = por %p173_p2, %p172_p1  ;;  %s159_s29 = ssub.s32 %s860_s22, %s1096_s26 }
   0xa   : > { %p618_p6 = scmp.ge.s32.totalorder %s864_s23, 1  ;;  %p160_p7 = scmp.eq.s32.totalorder %s159_s29, 0 }
   0xb   : > { %p947_p8 = por %p179_p5, %p178_p3  ;;  %p229_p9 = scmp.lt.s32.totalorder %s864_s23, 3 }
   0xc   : > { %s953_s6 = scalar_select %p160_p7, %s852_s20, %s162_s27  }
   0xd   : > { %p230_p10 = pnand %p618_p6, %p229_p9 }
   0xe   : > { %v292_v0 = vld [vmem:[%s1083_s1] sm:$0xff] (!%p230_p10)  ;;  %v293_v1 = vld [vmem:[%s1083_s1 + $0x8] sm:$0xff] (!%p230_p10)  ;;  %v294_v2 = vld [vmem:[%s1083_s1 + $0x10] sm:$0xff] (!%p230_p10)  ;;  %v866_v3 = vmov (!%p230_p10), 0.0|0.0   ;;  %vm867_vm0 = vmmov (!%p230_p10), 0   ;;  %v868_v6 = vmov (!%p230_p10), 0.0  }
   0xf   : > { %233 = sbr.rel (%p230_p10) target bundleno = 504 (0x1f8), region = 40  ;;  %696 = vmatprep.subr.bf16.mxu0 (!%p230_p10), %v866_v3  ;;  %v697_v4 = vpack.c.bf16 (!%p230_p10), %v293_v1, %v292_v0  ;;  %v295_v5 = vld [vmem:[%s1083_s1 + $0x18] sm:$0xff] (!%p230_p10)  ;;  %658 = vmatprep.mubr.msk.f32.mxu0 (!%p230_p10), %vm867_vm0, %v868_v6  ;;  %p268_p11 = scmp.lt.s32.totalorder (!%p230_p10), %s856_s21, 1  ;;  %vm289_vm1 = vcmask (!%p230_p10), 261120   ;;  %v387_v7 = vld [vmem:[%s1085_s3] sm:$0xff] (!%p230_p10)  ;;  %v388_v8 = vld [vmem:[%s1085_s3 + $0x8] sm:$0xff] (!%p230_p10) }
  0x10   : > { %290 = vst.msk [vmem:[#allocation2] sm:$0xff] (!%p230_p10), %vm289_vm1, %v868_v6  ;;  %702 = vmatprep.subr.bf16.mxu1 (!%p230_p10), %v866_v3  ;;  %v703_v9 = vpack.c.bf16 (!%p230_p10), %v388_v8, %v387_v7  ;;  %693 = vmatprep.mubr.msk.f32.mxu1 (!%p230_p10), %vm867_vm0, %v868_v6  ;;  %v700_v10 = vpack.c.bf16 (!%p230_p10), %v295_v5, %v294_v2  ;;  %v389_v12 = vld [vmem:[%s1085_s3 + $0x10] sm:$0xff] (!%p230_p10)  ;;  %v390_v13 = vld [vmem:[%s1085_s3 + $0x18] sm:$0xff] (!%p230_p10)  ;;  %v391_v15 = vld [vmem:[%s1085_s3 + $0x20] sm:$0xff] (!%p230_p10)  ;;  %s265_s9 = sand.u32 (!%p230_p10), 1, %s848_s19   ;;  %s625_s13 = sshll.u32 (!%p230_p10), %s856_s21, 7 }
  0x11   : > { %698 = vmatpush3.bf16.msra.mxu0 (!%p230_p10), %v697_v4  ;;  %v706_v14 = vpack.c.bf16 (!%p230_p10), %v390_v13, %v389_v12  ;;  %v392_v16 = vld [vmem:[%s1085_s3 + $0x28] sm:$0xff] (!%p230_p10)  ;;  %v393_v18 = vld [vmem:[%s1085_s3 + $0x30] sm:$0xff] (!%p230_p10)  ;;  %v394_v19 = vld [vmem:[%s1085_s3 + $0x38] sm:$0xff] (!%p230_p10)  ;;  %s619_s10 = sshll.u32 (!%p230_p10), %s265_s9, 3  ;;  %s1034_s24 = scalar_lea.hbm (!%p230_p10), %s1087_s5, %s625_s13 }
  0x12   : > { %699 = vmatprep.subr.bf16.mxu0 (!%p230_p10), %v866_v3  ;;  %704 = vmatpush3.bf16.msra.mxu1 (!%p230_p10), %v703_v9  ;;  %v709_v17 = vpack.c.bf16 (!%p230_p10), %v392_v16, %v391_v15  ;;  %v712_v20 = vpack.c.bf16 (!%p230_p10), %v394_v19, %v393_v18  ;;  %v395_v21 = vld [vmem:[%s1085_s3 + $0x40] sm:$0xff] (!%p230_p10)  ;;  %v396_v22 = vld [vmem:[%s1085_s3 + $0x48] sm:$0xff] (!%p230_p10)  ;;  %v397_v24 = vld [vmem:[%s1085_s3 + $0x50] sm:$0xff] (!%p230_p10)  ;;  %s267_s14 = scalar_lea.vmem (!%p230_p10), [#allocation3], %s619_s10 }
  0x13   : > { %705 = vmatprep.subr.bf16.mxu1 (!%p230_p10), %v866_v3  ;;  %v715_v23 = vpack.c.bf16 (!%p230_p10), %v396_v22, %v395_v21  ;;  %v398_v25 = vld [vmem:[%s1085_s3 + $0x58] sm:$0xff] (!%p230_p10)  ;;  %v399_v27 = vld [vmem:[%s1085_s3 + $0x60] sm:$0xff] (!%p230_p10)  ;;  %v400_v28 = vld [vmem:[%s1085_s3 + $0x68] sm:$0xff] (!%p230_p10)  ;;  %s502_s15 = sshll.u32 (!%p230_p10), %s267_s14, 4  ;;  %s1036_s15 = int_to_ptr.vmem [resolvable:$true] %s502_s15 }
  0x14   : > { %v718_v26 = vpack.c.bf16 (!%p230_p10), %v398_v25, %v397_v24  ;;  %v721_v29 = vpack.c.bf16 (!%p230_p10), %v400_v28, %v399_v27  ;;  %v401_v30 = vld [vmem:[%s1085_s3 + $0x70] sm:$0xff] (!%p230_p10)  ;;  %v402_v31 = vld [vmem:[%s1085_s3 + $0x78] sm:$0xff] (!%p230_p10)  ;;  %v621_v33 = vld [vmem:[%s1084_s2] ss:$0 sm:$0xff] (!%p230_p10) }
  0x15   : > { %701 = vmatpush3.bf16.msra.mxu0 (!%p230_p10), %v700_v10  ;;  %v724_v32 = vpack.c.bf16 (!%p230_p10), %v402_v31, %v401_v30  ;;  %v623_v50 = vld [vmem:[%s1086_s4] ss:$0 sm:$0xff] (!%p230_p10) }
  0x16   : > { %s269_s25 = scalar_select %p268_p11, %s856_s21, 1  ;;  %707 = vmatpush3.bf16.msra.mxu1 %v706_v14 }
  0x17   : > { %708 = vmatprep.subr.bf16.mxu1 %v866_v3  ;;  %v386_v46 = vld [vmem:[#allocation2] sm:$0xff]  ;;  %s869_s21 = smov [#allocation3]  }
  0x18   : > { %s620_s27 = sshll.u32 %s269_s25, 3  ;;  %s489_s25 = scalar_lea.sflag [#allocation4], %s265_s9 }
  0x19   : > { %s271_s8 = scalar_lea.vmem %s1082_s0, %s620_s27  ;;  %s786_s27 = scalar_lea.vmem %s1036_s15, 128 }
  0x1a   : > { %v291_v11 = vld [vmem:[%s271_s8] sm:$0xff]  ;;  %710 = vmatpush3.bf16.msra.mxu1 %v709_v17  ;;  %p787_p12 = scmp.ne.s32.totalorder %s1036_s15, %s786_s27  ;;  %s790_s29 = sshll.u32 %s869_s21, 4  ;;  %s791_s29 = int_to_ptr.vmem [resolvable:$false] %s790_s29 }
  0x1b   : > { %659 = vmatmul.mubr.msk.f32.vlgmr.msra.gmra.mrb[0].mxu0 %vm289_vm1, %v291_v11  ;;  %711 = vmatprep.subr.bf16.mxu1 %v866_v3  ;;  %s792_s7 = scalar_lea.vmem %s791_s29, 256  ;;  %p793_p1 = scmp.lt.s32.totalorder %s1036_s15, %s791_s29 }
  0x1c   : > { %p788_p13 = pnand %p787_p12, %p940_p4  ;;  %p794_p2 = scmp.lt.s32.totalorder %s792_s7, %s786_s27 }
  0x1e   : > { %713 = vmatpush3.bf16.msra.mxu1 %v712_v20  ;;  %p789_p0 = pneg %p788_p13  ;;  %p795_p3 = por %p794_p2, %p793_p1 }
  0x1f   : > { %714 = vmatprep.subr.bf16.mxu1 %v866_v3 }
  0x20   : > { %p796_p5 = pnand %p795_p3, %p789_p0 }
  0x22   : > { %716 = vmatpush3.bf16.msra.mxu1 %v715_v23 }
  0x23   : > { %717 = vmatprep.subr.bf16.mxu1 %v866_v3 }
  0x26   : > { %719 = vmatpush3.bf16.msra.mxu1 %v718_v26 }
  0x27   : > { %720 = vmatprep.subr.bf16.mxu1 %v866_v3 }
  0x2a   : > { %722 = vmatpush3.bf16.msra.mxu1 %v721_v29 }
  0x2b   : > { %723 = vmatprep.subr.bf16.mxu1 %v866_v3 }
  0x2e   : > { %725 = vmatpush3.bf16.msra.mxu1 %v724_v32 }
  0xee   : > { %v373_v34 = vpop.f32.mrb[0].mxu0 }
  0xef   : > { %v374_v35 = vadd.f32 %v621_v33, %v373_v34  ;;  %v660_v36 = vpop.f32.mrb[1].mxu0 }
  0xf1   : > { %v378_v37 = vmul.f32 %v374_v35, %v374_v35  ;;  %v377_v43 = vmul.f32 0.5, %v374_v35 }
  0xf3   : > { %v379_v38 = vmul.f32 %v378_v37, %v374_v35 }
  0xf5   : > { %v380_v39 = vmul.f32 0.044715, %v379_v38 }
  0xf7   : > { %v381_v40 = vadd.f32 %v380_v39, %v374_v35 }
  0xf9   : > { %v382_v41 = vmul.f32 0.7978846, %v381_v40 }
  0xfb   : > { %784 = vtanh.f32 %v382_v41 }
 0x105   : > { %v785_v42 = vpop.eup %784 }
 0x106   : > { %v384_v44 = vadd.f32 1.0, %v785_v42 }
 0x108   : > { %v385_v45 = vmul.f32 %v384_v44, %v377_v43 }
 0x10a   : > { %694 = vmatmul.mubr.f32.vlgmr.msra.gmra.mrb[0].mxu1 %v385_v45 }
 0x1dd   : > { %v469_v47 = vpop.f32.mrb[0].mxu1 }
 0x1de   : > { %v473_v48 = vadd.f32 %v469_v47, %v386_v46  ;;  %v695_v49 = vpop.f32.mrb[1].mxu1 }
 0x1e0   : > { %474 = vst.msk [vmem:[#allocation2] sm:$0xff] %vm289_vm1, %v473_v48 }
 0x1e7   : > { %v478_v51 = vld [vmem:[#allocation2] sm:$0xff] }
 0x1e8   : > { %v486_v52 = vadd.f32 %v623_v50, %v478_v51 }
 0x1ea   : > { %487 = vst.msk [vmem:[%s267_s14] sm:$0xff] %vm289_vm1, %v486_v52 }
 0x1eb   : > { %799 = shalt.err (!%p796_p5)
}
 0x1ec   : > { %s800_s8 = scalar_lea.hbm %s1034_s24, 128  ;;  %s804_s11 = scalar_lea.hbm %s1087_s5, 256 }
 0x1ed   : > { %p801_p6 = scmp.ne.s32.totalorder %s1034_s24, %s800_s8  ;;  %p805_p10 = scmp.lt.u32.totalorder %s1034_s24, %s1087_s5 }
 0x1ee   : > { %p806_p11 = scmp.lt.u32.totalorder %s804_s11, %s800_s8  ;;  %p808_p13 = scmp.lt.u32.totalorder %s800_s8, %s1034_s24 }
 0x1ef   : > { %p802_p7 = pnand %p801_p6, %p940_p4 }
 0x1f0   : > { %p807_p12 = por %p806_p11, %p805_p10 }
 0x1f1   : > { %p803_p9 = pneg %p802_p7 }
 0x1f2   : > { %p809_p0 = por %p808_p13, %p807_p12 }
 0x1f4   : > { %p810_p1 = pnand %p809_p0, %p803_p9 }
 0x1f6   : > { %813 = shalt.err (!%p810_p1)
}
 0x1f7   : > { %726 = dma.vmem_to_hbm [thread:$0]  (%p940_p4), %s1036_s15, 128, %s1034_s24, %s489_s25  }
 0x1f8 PF: > { %p732_p2 = scmp.ge.s32.totalorder %s864_s23, 2  ;;  %s514_s14 = sand.u32 1, %s844_s18  }
 0x1f9   : > { %s515_s16 = scalar_lea.sflag [#allocation4], %s514_s14 }
 0x1fa   : > { %p729_p3 = pnand %p732_p2, %p947_p8 }
 0x1fc   : > { %839 = dma.done.wait (!%p729_p3), %s515_s16, 128  }
 0x1fd   : > { %841 = vsyncadd (!%p729_p3), %s515_s16, 4294967168  ;;  %s18_s23 = sadd.s32 1, %s864_s23   ;;  %s1090_s18 = smov %s848_s19 }
 0x1fe   : > { %p15_p5 = scmp.ge.s32.totalorder %s18_s23, 4   ;;  %s1091_s19 = smov %s852_s20 }
 0x1ff   : > { %s1092_s20 = smov %s953_s6  ;;  %s1093_s21 = smov %s860_s22 }
 0x200   : > { %s1094_s22 = smov %s1096_s26  ;;  %17 = sbr.rel (!%p15_p5) target bundleno = 4 (0x4), region = 92 }
 0x207   :  { %520 = vsyncpa [#allocation4], 1 }
 0x208   :  { %522 = vsyncpa [#allocation4 + $0x1], 1 }

</bundles_post_ra>
